<compile_context>
chip_gen: v7x
topology: tpu7x:2x2x1
jax: 0.10.0
libtpu: 0.0.40
codegen_flags: <defaults>
</compile_context>

<pallas_src>
import functools

import jax
import jax.numpy as jnp
from jax.experimental import pallas as pl
from jax.experimental.pallas import tpu as pltpu


LN_EPS = 1e-5
LANE = 128


def _round_up(n, m):
    return ((n + m - 1) // m) * m


def _tb_cap():
    """Batch-tile cap: 128 on v5 (128-wide MXU), 256 on v6e/v7x."""
    try:
        kind = jax.devices()[0].device_kind.lower()
    except Exception:
        return 256
    return 128 if "v5" in kind else 256


def _fused_mlp_kernel(x_ref, w_ref, b_ref, g_ref, beta_ref, wo_ref, bo_ref,
                      o_ref, *, h_true):
    """Fused [Linear -> LayerNorm -> ReLU] * L  ->  Linear head.

    x_ref:    (TB, DPAD)        f32 activations (batch tile, lane-padded)
    w_ref:    (L, DPAD, DPAD)   bf16 stacked fc weights (zero-padded)
    b_ref:    (L, DPAD)         f32 fc biases (zero-padded)
    g_ref:    (L, DPAD)         f32 LayerNorm gamma (zero-padded)
    beta_ref: (L, DPAD)         f32 LayerNorm beta  (zero-padded)
    wo_ref:   (DPAD, OPAD)      bf16 output-head weight (zero-padded)
    bo_ref:   (1, OPAD)         f32 output-head bias (zero-padded)
    o_ref:    (TB, OPAD)        f32 lane-dense output slab
    """
    num_layers, dpad, _ = w_ref.shape
    inv_h = 1.0 / float(h_true)
    n_pad_lanes = float(dpad - h_true)

    h = x_ref[...]                                     # (TB, DPAD) f32
    for l in range(num_layers):                        # static unroll
        w = w_ref[l]                                   # (DPAD, DPAD) bf16
        b = b_ref[l:l + 1, :]                          # (1, DPAD) f32
        g = g_ref[l:l + 1, :]
        beta = beta_ref[l:l + 1, :]

        # Linear: bf16 operands, f32 accumulation on the MXU.
        # Padded output lanes of y are exactly 0 (zero weight cols, zero bias).
        y = jnp.dot(h.astype(jnp.bfloat16), w,
                    preferred_element_type=jnp.float32) + b

        # LayerNorm over the true h_true features (eps=1e-5, biased variance).
        # mean: padded lanes contribute 0 to the sum; divide by h_true.
        mean = jnp.sum(y, axis=-1, keepdims=True) * inv_h
        diff = y - mean
        # Exact variance over true lanes: padded lanes of diff equal -mean,
        # so subtract their (dpad - h_true) * mean^2 contribution.
        var = (jnp.sum(diff * diff, axis=-1, keepdims=True)
               - n_pad_lanes * mean * mean) * inv_h
        y = diff * jax.lax.rsqrt(var + LN_EPS) * g + beta  # padded lanes -> 0

        # ReLU (Dropout is identity in eval mode).
        h = jnp.maximum(y, 0.0)

    # Output head — lane-dense store into the OPAD slab.
    o_ref[...] = jnp.dot(h.astype(jnp.bfloat16), wo_ref[...],
                         preferred_element_type=jnp.float32) + bo_ref[...]


def _pad2(a, r, c):
    return jnp.pad(a.astype(jnp.float32), ((0, r - a.shape[0]), (0, c - a.shape[1])))


def _pad1(a, n):
    return jnp.pad(a.astype(jnp.float32), ((0, n - a.shape[0]),))


def pack_params(params, dpad, opad):
    """Zero-pad and stack per-layer params into lane-dense tensors.

    Weights are stored in bf16 (bf16 cast of 0.0 is exactly 0.0, preserving the
    padded-lane invariant); bias / gamma / beta stay f32.
    """
    w_stack = jnp.stack(
        [_pad2(l["w"], dpad, dpad) for l in params["fc"]]).astype(jnp.bfloat16)
    b_stack = jnp.stack([_pad1(l["b"], dpad) for l in params["fc"]])
    g_stack = jnp.stack([_pad1(l["gamma"], dpad) for l in params["fc"]])
    beta_stack = jnp.stack([_pad1(l["beta"], dpad) for l in params["fc"]])
    wo = _pad2(params["out"]["w"], dpad, opad).astype(jnp.bfloat16)
    bo = _pad1(params["out"]["b"], opad).reshape(1, opad)
    return w_stack, b_stack, g_stack, beta_stack, wo, bo


@functools.partial(
    jax.jit,
    static_argnames=("hidden_dim", "output_dim", "single_buffer_weights"))
def emotion_regression_forward(x, w_stack, b_stack, g_stack, beta_stack, wo, bo,
                               *, hidden_dim, output_dim,
                               single_buffer_weights=True):
    """Fused forward pass. x: (B, input_dim) f32 -> (B, output_dim) f32."""
    b_rows, d_in = x.shape
    num_layers, dpad, _ = w_stack.shape
    opad = wo.shape[1]

    # Batch tiling: sublane-aligned tile, 1-D "parallel" grid over the batch.
    b_pad = max(_round_up(b_rows, 8), 8)
    tb = min(b_pad, _tb_cap())
    if b_pad // tb == 1 and b_pad >= 16:
        # Prefer >=2 grid steps when the batch permits (pipelining / megacore).
        tb = _round_up(pl.cdiv(b_pad, 2), 8)
    b_pad = _round_up(b_pad, tb)
    x_pad = jnp.pad(x.astype(jnp.float32), ((0, b_pad - b_rows), (0, dpad - d_in)))

    # Grid-invariant weights: single-buffer them (index_map is constant).
    weight_mode = dict(pipeline_mode=pl.Buffered(1)) if single_buffer_weights else {}
    bufs = 1 if single_buffer_weights else 2

    # Explicit VMEM budget (bf16 weights, f32 params/activations) + headroom.
    weight_bytes = bufs * (num_layers * dpad * dpad * 2          # fc weights
                           + 3 * num_layers * dpad * 4           # b/gamma/beta
                           + dpad * opad * 2 + opad * 4)         # head
    act_bytes = 2 * tb * dpad * 4 + 2 * tb * opad * 4            # double-buffered io
    vmem_limit = int(min(max(2 * (weight_bytes + act_bytes) + (4 << 20), 16 << 20),
                         64 << 20))

    kernel = functools.partial(_fused_mlp_kernel, h_true=hidden_dim)
    out_pad = pl.pallas_call(
        kernel,
        out_shape=jax.ShapeDtypeStruct((b_pad, opad), jnp.float32),
        grid=(b_pad // tb,),
        in_specs=[
            pl.BlockSpec((tb, dpad), lambda i: (i, 0)),                       # acts
            pl.BlockSpec((num_layers, dpad, dpad), lambda i: (0, 0, 0),
                         **weight_mode),                                      # fc W
            pl.BlockSpec((num_layers, dpad), lambda i: (0, 0), **weight_mode),  # b
            pl.BlockSpec((num_layers, dpad), lambda i: (0, 0), **weight_mode),  # gamma
            pl.BlockSpec((num_layers, dpad), lambda i: (0, 0), **weight_mode),  # beta
            pl.BlockSpec((dpad, opad), lambda i: (0, 0), **weight_mode),      # head W
            pl.BlockSpec((1, opad), lambda i: (0, 0), **weight_mode),         # head b
        ],
        out_specs=pl.BlockSpec((tb, opad), lambda i: (i, 0)),
        compiler_params=pltpu.CompilerParams(
            dimension_semantics=("parallel",),
            vmem_limit_bytes=vmem_limit,
        ),
    )(x_pad, w_stack, b_stack, g_stack, beta_stack, wo, bo)

    return out_pad[:b_rows, :output_dim]


def init_params(key, input_dim, hidden_dim, num_layers, output_dim):
    """Deterministic synthetic parameter init (mimics nn.Linear/nn.LayerNorm)."""
    params = {"fc": []}
    dims = [input_dim] + [hidden_dim] * num_layers
    for lidx in range(num_layers):
        key, kw, kb = jax.random.split(key, 3)
        d_in, d_out = dims[lidx], dims[lidx + 1]
        bound = 1.0 / jnp.sqrt(d_in)
        params["fc"].append(
            dict(
                w=jax.random.uniform(kw, (d_in, d_out), jnp.float32, -bound, bound),
                b=jax.random.uniform(kb, (d_out,), jnp.float32, -bound, bound),
                gamma=jnp.ones((d_out,), jnp.float32),
                beta=jnp.zeros((d_out,), jnp.float32),
            )
        )
    key, kw, kb = jax.random.split(key, 3)
    bound = 1.0 / jnp.sqrt(hidden_dim)
    params["out"] = dict(
        w=jax.random.uniform(kw, (hidden_dim, output_dim), jnp.float32, -bound, bound),
        b=jax.random.uniform(kb, (output_dim,), jnp.float32, -bound, bound),
    )
    return params


def _reference_forward(x, params, *, bf16_matmul=False):
    """Pure-JAX reference with original (unpadded) params — eval-mode semantics."""
    def mm(a, w):
        if bf16_matmul:
            return jnp.dot(a.astype(jnp.bfloat16), w.astype(jnp.bfloat16),
                           preferred_element_type=jnp.float32)
        return jnp.dot(a, w, preferred_element_type=jnp.float32)

    h = x
    for layer in params["fc"]:
        y = mm(h, layer["w"]) + layer["b"]
        mean = jnp.mean(y, axis=-1, keepdims=True)
        var = jnp.mean((y - mean) ** 2, axis=-1, keepdims=True)
        y = (y - mean) * jax.lax.rsqrt(var + LN_EPS) * layer["gamma"] + layer["beta"]
        h = jnp.maximum(y, 0.0)
    return mm(h, params["out"]["w"]) + params["out"]["b"]


if __name__ == "__main__":
    # Small shapes consistent with the module: x is (batch, input_dim).
    batch, input_dim, hidden_dim, num_layers, output_dim = 8, 32, 32, 3, 4

    key = jax.random.PRNGKey(0)
    kx, kp = jax.random.split(key)
    x = jax.random.normal(kx, (batch, input_dim), jnp.float32)
    params = init_params(kp, input_dim, hidden_dim, num_layers, output_dim)

    # Lane-dense packing of parameters (done once, outside the hot path).
    dpad = _round_up(max(input_dim, hidden_dim), LANE)
    opad = _round_up(output_dim, LANE)
    packed = pack_params(params, dpad, opad)

    try:
        out = emotion_regression_forward(
            x, *packed, hidden_dim=hidden_dim, output_dim=output_dim,
            single_buffer_weights=True)
        out = jax.block_until_ready(out)
    except Exception:
        # Fallback for jax versions that reject pipeline_mode on pallas_call inputs.
        out = emotion_regression_forward(
            x, *packed, hidden_dim=hidden_dim, output_dim=output_dim,
            single_buffer_weights=False)
        out = jax.block_until_ready(out)

    assert out.shape == (batch, output_dim)

    # Tight check against a reference using the same bf16-operand matmuls.
    ref_bf16 = _reference_forward(x, params, bf16_matmul=True)
    assert jnp.allclose(out, ref_bf16, atol=5e-3, rtol=5e-3), \
        "mismatch vs bf16-matmul JAX reference"
    # Loose check against the full-f32 reference (bf16 quantization error only).
    ref_f32 = _reference_forward(x, params, bf16_matmul=False)
    assert jnp.allclose(out, ref_f32, atol=5e-2, rtol=5e-2), \
        "mismatch vs f32 JAX reference"

    print("KERNEL_OK")
</pallas_src>

<mosaic_0001>
module attributes {stable_mosaic.version = 11 : i64} {
  func.func @_fused_mlp_kernel(%arg0: i32, %arg1: memref<8x128xf32, #tpu.memory_space<vmem>>, %arg2: memref<3x128x128xbf16, #tpu.memory_space<vmem>>, %arg3: memref<3x128xf32, #tpu.memory_space<vmem>>, %arg4: memref<3x128xf32, #tpu.memory_space<vmem>>, %arg5: memref<3x128xf32, #tpu.memory_space<vmem>>, %arg6: memref<128x128xbf16, #tpu.memory_space<vmem>>, %arg7: memref<1x128xf32, #tpu.memory_space<vmem>>, %arg8: memref<8x128xf32, #tpu.memory_space<vmem>>) attributes {dimension_semantics = [#tpu.dimension_semantics<parallel>], iteration_bounds = array<i64: 1>, scalar_prefetch = 0 : i64, scratch_operands = 0 : i64, tpu.core_type = #tpu.core_type<tc>, window_params = [{transform_indices = @transform_0, window_bounds = array<i64: 8, 128>}, {pipeline_mode = #tpu.pipeline_mode<synchronous>, transform_indices = @transform_1, window_bounds = array<i64: 3, 128, 128>}, {pipeline_mode = #tpu.pipeline_mode<synchronous>, transform_indices = @transform_2, window_bounds = array<i64: 3, 128>}, {pipeline_mode = #tpu.pipeline_mode<synchronous>, transform_indices = @transform_3, window_bounds = array<i64: 3, 128>}, {pipeline_mode = #tpu.pipeline_mode<synchronous>, transform_indices = @transform_4, window_bounds = array<i64: 3, 128>}, {pipeline_mode = #tpu.pipeline_mode<synchronous>, transform_indices = @transform_5, window_bounds = array<i64: 128, 128>}, {pipeline_mode = #tpu.pipeline_mode<synchronous>, transform_indices = @transform_6, window_bounds = array<i64: 1, 128>}, {transform_indices = @transform_7, window_bounds = array<i64: 8, 128>}]} {
    %c0 = arith.constant 0 : index
    %c0_0 = arith.constant 0 : index
    %0 = vector.load %arg1[%c0, %c0_0] : memref<8x128xf32, #tpu.memory_space<vmem>>, vector<8x128xf32>
    %c0_1 = arith.constant 0 : index
    %c0_2 = arith.constant 0 : index
    %c0_3 = arith.constant 0 : index
    %1 = vector.load %arg2[%c0_1, %c0_2, %c0_3] : memref<3x128x128xbf16, #tpu.memory_space<vmem>>, vector<1x128x128xbf16>
    %2 = vector.shape_cast %1 : vector<1x128x128xbf16> to vector<128x128xbf16>
    %c0_4 = arith.constant 0 : index
    %c0_5 = arith.constant 0 : index
    %3 = vector.load %arg3[%c0_4, %c0_5] : memref<3x128xf32, #tpu.memory_space<vmem>>, vector<1x128xf32>
    %c0_6 = arith.constant 0 : index
    %c0_7 = arith.constant 0 : index
    %4 = vector.load %arg4[%c0_6, %c0_7] : memref<3x128xf32, #tpu.memory_space<vmem>>, vector<1x128xf32>
    %c0_8 = arith.constant 0 : index
    %c0_9 = arith.constant 0 : index
    %5 = vector.load %arg5[%c0_8, %c0_9] : memref<3x128xf32, #tpu.memory_space<vmem>>, vector<1x128xf32>
    %6 = arith.truncf %0 : vector<8x128xf32> to vector<8x128xbf16>
    %cst = arith.constant dense<0.000000e+00> : vector<8x128xf32>
    %7 = tpu.matmul %6, %2, %cst {dimension_numbers = #tpu.dot_dimension_numbers<[1], [0], [0], [1], [0, 0, 1, 1], [], []>} : vector<8x128xbf16>, vector<128x128xbf16>, vector<8x128xf32> -> vector<8x128xf32>
    %8 = vector.broadcast %3 : vector<1x128xf32> to vector<8x128xf32>
    %9 = arith.addf %7, %8 : vector<8x128xf32>
    %cst_10 = arith.constant dense<0.000000e+00> : vector<8xf32>
    %10 = vector.multi_reduction <add>, %9, %cst_10 [1] : vector<8x128xf32> to vector<8xf32>
    %11 = vector.shape_cast %10 : vector<8xf32> to vector<8x1xf32>
    %cst_11 = arith.constant 3.125000e-02 : f32
    %12 = vector.broadcast %cst_11 : f32 to vector<8x1xf32>
    %13 = arith.mulf %11, %12 : vector<8x1xf32>
    %14 = vector.broadcast %13 : vector<8x1xf32> to vector<8x128xf32>
    %15 = arith.subf %9, %14 : vector<8x128xf32>
    %16 = arith.mulf %15, %15 : vector<8x128xf32>
    %cst_12 = arith.constant dense<0.000000e+00> : vector<8xf32>
    %17 = vector.multi_reduction <add>, %16, %cst_12 [1] : vector<8x128xf32> to vector<8xf32>
    %18 = vector.shape_cast %17 : vector<8xf32> to vector<8x1xf32>
    %cst_13 = arith.constant 9.600000e+01 : f32
    %19 = vector.broadcast %cst_13 : f32 to vector<8x1xf32>
    %20 = arith.mulf %19, %13 : vector<8x1xf32>
    %21 = arith.mulf %20, %13 : vector<8x1xf32>
    %22 = arith.subf %18, %21 : vector<8x1xf32>
    %cst_14 = arith.constant 3.125000e-02 : f32
    %23 = vector.broadcast %cst_14 : f32 to vector<8x1xf32>
    %24 = arith.mulf %22, %23 : vector<8x1xf32>
    %cst_15 = arith.constant 9.99999974E-6 : f32
    %25 = vector.broadcast %cst_15 : f32 to vector<8x1xf32>
    %26 = arith.addf %24, %25 : vector<8x1xf32>
    %27 = math.rsqrt %26 : vector<8x1xf32>
    %28 = vector.broadcast %27 : vector<8x1xf32> to vector<8x128xf32>
    %29 = arith.mulf %15, %28 : vector<8x128xf32>
    %30 = vector.broadcast %4 : vector<1x128xf32> to vector<8x128xf32>
    %31 = arith.mulf %29, %30 : vector<8x128xf32>
    %32 = vector.broadcast %5 : vector<1x128xf32> to vector<8x128xf32>
    %33 = arith.addf %31, %32 : vector<8x128xf32>
    %cst_16 = arith.constant 0.000000e+00 : f32
    %34 = vector.broadcast %cst_16 : f32 to vector<8x128xf32>
    %35 = arith.maximumf %33, %34 : vector<8x128xf32>
    %c1 = arith.constant 1 : index
    %c0_17 = arith.constant 0 : index
    %c0_18 = arith.constant 0 : index
    %36 = vector.load %arg2[%c1, %c0_17, %c0_18] : memref<3x128x128xbf16, #tpu.memory_space<vmem>>, vector<1x128x128xbf16>
    %37 = vector.shape_cast %36 : vector<1x128x128xbf16> to vector<128x128xbf16>
    %c1_19 = arith.constant 1 : index
    %c0_20 = arith.constant 0 : index
    %38 = vector.load %arg3[%c1_19, %c0_20] : memref<3x128xf32, #tpu.memory_space<vmem>>, vector<1x128xf32>
    %c1_21 = arith.constant 1 : index
    %c0_22 = arith.constant 0 : index
    %39 = vector.load %arg4[%c1_21, %c0_22] : memref<3x128xf32, #tpu.memory_space<vmem>>, vector<1x128xf32>
    %c1_23 = arith.constant 1 : index
    %c0_24 = arith.constant 0 : index
    %40 = vector.load %arg5[%c1_23, %c0_24] : memref<3x128xf32, #tpu.memory_space<vmem>>, vector<1x128xf32>
    %41 = arith.truncf %35 : vector<8x128xf32> to vector<8x128xbf16>
    %cst_25 = arith.constant dense<0.000000e+00> : vector<8x128xf32>
    %42 = tpu.matmul %41, %37, %cst_25 {dimension_numbers = #tpu.dot_dimension_numbers<[1], [0], [0], [1], [0, 0, 1, 1], [], []>} : vector<8x128xbf16>, vector<128x128xbf16>, vector<8x128xf32> -> vector<8x128xf32>
    %43 = vector.broadcast %38 : vector<1x128xf32> to vector<8x128xf32>
    %44 = arith.addf %42, %43 : vector<8x128xf32>
    %cst_26 = arith.constant dense<0.000000e+00> : vector<8xf32>
    %45 = vector.multi_reduction <add>, %44, %cst_26 [1] : vector<8x128xf32> to vector<8xf32>
    %46 = vector.shape_cast %45 : vector<8xf32> to vector<8x1xf32>
    %cst_27 = arith.constant 3.125000e-02 : f32
    %47 = vector.broadcast %cst_27 : f32 to vector<8x1xf32>
    %48 = arith.mulf %46, %47 : vector<8x1xf32>
    %49 = vector.broadcast %48 : vector<8x1xf32> to vector<8x128xf32>
    %50 = arith.subf %44, %49 : vector<8x128xf32>
    %51 = arith.mulf %50, %50 : vector<8x128xf32>
    %cst_28 = arith.constant dense<0.000000e+00> : vector<8xf32>
    %52 = vector.multi_reduction <add>, %51, %cst_28 [1] : vector<8x128xf32> to vector<8xf32>
    %53 = vector.shape_cast %52 : vector<8xf32> to vector<8x1xf32>
    %cst_29 = arith.constant 9.600000e+01 : f32
    %54 = vector.broadcast %cst_29 : f32 to vector<8x1xf32>
    %55 = arith.mulf %54, %48 : vector<8x1xf32>
    %56 = arith.mulf %55, %48 : vector<8x1xf32>
    %57 = arith.subf %53, %56 : vector<8x1xf32>
    %cst_30 = arith.constant 3.125000e-02 : f32
    %58 = vector.broadcast %cst_30 : f32 to vector<8x1xf32>
    %59 = arith.mulf %57, %58 : vector<8x1xf32>
    %cst_31 = arith.constant 9.99999974E-6 : f32
    %60 = vector.broadcast %cst_31 : f32 to vector<8x1xf32>
    %61 = arith.addf %59, %60 : vector<8x1xf32>
    %62 = math.rsqrt %61 : vector<8x1xf32>
    %63 = vector.broadcast %62 : vector<8x1xf32> to vector<8x128xf32>
    %64 = arith.mulf %50, %63 : vector<8x128xf32>
    %65 = vector.broadcast %39 : vector<1x128xf32> to vector<8x128xf32>
    %66 = arith.mulf %64, %65 : vector<8x128xf32>
    %67 = vector.broadcast %40 : vector<1x128xf32> to vector<8x128xf32>
    %68 = arith.addf %66, %67 : vector<8x128xf32>
    %cst_32 = arith.constant 0.000000e+00 : f32
    %69 = vector.broadcast %cst_32 : f32 to vector<8x128xf32>
    %70 = arith.maximumf %68, %69 : vector<8x128xf32>
    %c2 = arith.constant 2 : index
    %c0_33 = arith.constant 0 : index
    %c0_34 = arith.constant 0 : index
    %71 = vector.load %arg2[%c2, %c0_33, %c0_34] : memref<3x128x128xbf16, #tpu.memory_space<vmem>>, vector<1x128x128xbf16>
    %72 = vector.shape_cast %71 : vector<1x128x128xbf16> to vector<128x128xbf16>
    %c2_35 = arith.constant 2 : index
    %c0_36 = arith.constant 0 : index
    %73 = vector.load %arg3[%c2_35, %c0_36] : memref<3x128xf32, #tpu.memory_space<vmem>>, vector<1x128xf32>
    %c2_37 = arith.constant 2 : index
    %c0_38 = arith.constant 0 : index
    %74 = vector.load %arg4[%c2_37, %c0_38] : memref<3x128xf32, #tpu.memory_space<vmem>>, vector<1x128xf32>
    %c2_39 = arith.constant 2 : index
    %c0_40 = arith.constant 0 : index
    %75 = vector.load %arg5[%c2_39, %c0_40] : memref<3x128xf32, #tpu.memory_space<vmem>>, vector<1x128xf32>
    %76 = arith.truncf %70 : vector<8x128xf32> to vector<8x128xbf16>
    %cst_41 = arith.constant dense<0.000000e+00> : vector<8x128xf32>
    %77 = tpu.matmul %76, %72, %cst_41 {dimension_numbers = #tpu.dot_dimension_numbers<[1], [0], [0], [1], [0, 0, 1, 1], [], []>} : vector<8x128xbf16>, vector<128x128xbf16>, vector<8x128xf32> -> vector<8x128xf32>
    %78 = vector.broadcast %73 : vector<1x128xf32> to vector<8x128xf32>
    %79 = arith.addf %77, %78 : vector<8x128xf32>
    %cst_42 = arith.constant dense<0.000000e+00> : vector<8xf32>
    %80 = vector.multi_reduction <add>, %79, %cst_42 [1] : vector<8x128xf32> to vector<8xf32>
    %81 = vector.shape_cast %80 : vector<8xf32> to vector<8x1xf32>
    %cst_43 = arith.constant 3.125000e-02 : f32
    %82 = vector.broadcast %cst_43 : f32 to vector<8x1xf32>
    %83 = arith.mulf %81, %82 : vector<8x1xf32>
    %84 = vector.broadcast %83 : vector<8x1xf32> to vector<8x128xf32>
    %85 = arith.subf %79, %84 : vector<8x128xf32>
    %86 = arith.mulf %85, %85 : vector<8x128xf32>
    %cst_44 = arith.constant dense<0.000000e+00> : vector<8xf32>
    %87 = vector.multi_reduction <add>, %86, %cst_44 [1] : vector<8x128xf32> to vector<8xf32>
    %88 = vector.shape_cast %87 : vector<8xf32> to vector<8x1xf32>
    %cst_45 = arith.constant 9.600000e+01 : f32
    %89 = vector.broadcast %cst_45 : f32 to vector<8x1xf32>
    %90 = arith.mulf %89, %83 : vector<8x1xf32>
    %91 = arith.mulf %90, %83 : vector<8x1xf32>
    %92 = arith.subf %88, %91 : vector<8x1xf32>
    %cst_46 = arith.constant 3.125000e-02 : f32
    %93 = vector.broadcast %cst_46 : f32 to vector<8x1xf32>
    %94 = arith.mulf %92, %93 : vector<8x1xf32>
    %cst_47 = arith.constant 9.99999974E-6 : f32
    %95 = vector.broadcast %cst_47 : f32 to vector<8x1xf32>
    %96 = arith.addf %94, %95 : vector<8x1xf32>
    %97 = math.rsqrt %96 : vector<8x1xf32>
    %98 = vector.broadcast %97 : vector<8x1xf32> to vector<8x128xf32>
    %99 = arith.mulf %85, %98 : vector<8x128xf32>
    %100 = vector.broadcast %74 : vector<1x128xf32> to vector<8x128xf32>
    %101 = arith.mulf %99, %100 : vector<8x128xf32>
    %102 = vector.broadcast %75 : vector<1x128xf32> to vector<8x128xf32>
    %103 = arith.addf %101, %102 : vector<8x128xf32>
    %cst_48 = arith.constant 0.000000e+00 : f32
    %104 = vector.broadcast %cst_48 : f32 to vector<8x128xf32>
    %105 = arith.maximumf %103, %104 : vector<8x128xf32>
    %106 = arith.truncf %105 : vector<8x128xf32> to vector<8x128xbf16>
    %c0_49 = arith.constant 0 : index
    %c0_50 = arith.constant 0 : index
    %107 = vector.load %arg6[%c0_49, %c0_50] : memref<128x128xbf16, #tpu.memory_space<vmem>>, vector<128x128xbf16>
    %cst_51 = arith.constant dense<0.000000e+00> : vector<8x128xf32>
    %108 = tpu.matmul %106, %107, %cst_51 {dimension_numbers = #tpu.dot_dimension_numbers<[1], [0], [0], [1], [0, 0, 1, 1], [], []>} : vector<8x128xbf16>, vector<128x128xbf16>, vector<8x128xf32> -> vector<8x128xf32>
    %c0_52 = arith.constant 0 : index
    %c0_53 = arith.constant 0 : index
    %109 = vector.load %arg7[%c0_52, %c0_53] : memref<1x128xf32, #tpu.memory_space<vmem>>, vector<1x128xf32>
    %110 = vector.broadcast %109 : vector<1x128xf32> to vector<8x128xf32>
    %111 = arith.addf %108, %110 : vector<8x128xf32>
    %c0_54 = arith.constant 0 : index
    %c0_55 = arith.constant 0 : index
    %112 = vector.load %arg8[%c0_54, %c0_55] : memref<8x128xf32, #tpu.memory_space<vmem>>, vector<8x128xf32>
    tpu.vector_store %arg8[%c0_54, %c0_55], %111 {strides = array<i32>} : memref<8x128xf32, #tpu.memory_space<vmem>>, vector<8x128xf32>,
    return
  }
  func.func @transform_0(%arg0: i32) -> (i32, i32) {
    %c0_i32 = arith.constant 0 : i32
    %c0_i32_0 = arith.constant 0 : i32
    return %arg0, %c0_i32 : i32, i32
  }
  func.func @transform_1(%arg0: i32) -> (i32, i32, i32) {
    %c0_i32 = arith.constant 0 : i32
    %c0_i32_0 = arith.constant 0 : i32
    %c0_i32_1 = arith.constant 0 : i32
    %c0_i32_2 = arith.constant 0 : i32
    return %c0_i32, %c0_i32_0, %c0_i32_1 : i32, i32, i32
  }
  func.func @transform_2(%arg0: i32) -> (i32, i32) {
    %c0_i32 = arith.constant 0 : i32
    %c0_i32_0 = arith.constant 0 : i32
    %c0_i32_1 = arith.constant 0 : i32
    return %c0_i32, %c0_i32_0 : i32, i32
  }
  func.func @transform_3(%arg0: i32) -> (i32, i32) {
    %c0_i32 = arith.constant 0 : i32
    %c0_i32_0 = arith.constant 0 : i32
    %c0_i32_1 = arith.constant 0 : i32
    return %c0_i32, %c0_i32_0 : i32, i32
  }
  func.func @transform_4(%arg0: i32) -> (i32, i32) {
    %c0_i32 = arith.constant 0 : i32
    %c0_i32_0 = arith.constant 0 : i32
    %c0_i32_1 = arith.constant 0 : i32
    return %c0_i32, %c0_i32_0 : i32, i32
  }
  func.func @transform_5(%arg0: i32) -> (i32, i32) {
    %c0_i32 = arith.constant 0 : i32
    %c0_i32_0 = arith.constant 0 : i32
    %c0_i32_1 = arith.constant 0 : i32
    return %c0_i32, %c0_i32_0 : i32, i32
  }
  func.func @transform_6(%arg0: i32) -> (i32, i32) {
    %c0_i32 = arith.constant 0 : i32
    %c0_i32_0 = arith.constant 0 : i32
    %c0_i32_1 = arith.constant 0 : i32
    return %c0_i32, %c0_i32_0 : i32, i32
  }
  func.func @transform_7(%arg0: i32) -> (i32, i32) {
    %c0_i32 = arith.constant 0 : i32
    %c0_i32_0 = arith.constant 0 : i32
    return %arg0, %c0_i32 : i32, i32
  }
}

module attributes {stable_mosaic.version = 11 : i64} {
  func.func @_fused_mlp_kernel(%arg0: i32, %arg1: memref<8x128xf32, #tpu.memory_space<vmem>>, %arg2: memref<3x128x128xbf16, #tpu.memory_space<vmem>>, %arg3: memref<3x128xf32, #tpu.memory_space<vmem>>, %arg4: memref<3x128xf32, #tpu.memory_space<vmem>>, %arg5: memref<3x128xf32, #tpu.memory_space<vmem>>, %arg6: memref<128x128xbf16, #tpu.memory_space<vmem>>, %arg7: memref<1x128xf32, #tpu.memory_space<vmem>>, %arg8: memref<8x128xf32, #tpu.memory_space<vmem>>) attributes {dimension_semantics = [#tpu.dimension_semantics<parallel>], iteration_bounds = array<i64: 1>, scalar_prefetch = 0 : i64, scratch_operands = 0 : i64, tpu.core_type = #tpu.core_type<tc>, window_params = [{transform_indices = @transform_0, window_bounds = array<i64: 8, 128>}, {pipeline_mode = #tpu.pipeline_mode<synchronous>, transform_indices = @transform_1, window_bounds = array<i64: 3, 128, 128>}, {pipeline_mode = #tpu.pipeline_mode<synchronous>, transform_indices = @transform_2, window_bounds = array<i64: 3, 128>}, {pipeline_mode = #tpu.pipeline_mode<synchronous>, transform_indices = @transform_3, window_bounds = array<i64: 3, 128>}, {pipeline_mode = #tpu.pipeline_mode<synchronous>, transform_indices = @transform_4, window_bounds = array<i64: 3, 128>}, {pipeline_mode = #tpu.pipeline_mode<synchronous>, transform_indices = @transform_5, window_bounds = array<i64: 128, 128>}, {pipeline_mode = #tpu.pipeline_mode<synchronous>, transform_indices = @transform_6, window_bounds = array<i64: 1, 128>}, {transform_indices = @transform_7, window_bounds = array<i64: 8, 128>}]} {
    %c0 = arith.constant 0 : index
    %c0_0 = arith.constant 0 : index
    %0 = vector.load %arg1[%c0, %c0_0] : memref<8x128xf32, #tpu.memory_space<vmem>>, vector<8x128xf32>
    %c0_1 = arith.constant 0 : index
    %c0_2 = arith.constant 0 : index
    %c0_3 = arith.constant 0 : index
    %1 = vector.load %arg2[%c0_1, %c0_2, %c0_3] : memref<3x128x128xbf16, #tpu.memory_space<vmem>>, vector<1x128x128xbf16>
    %2 = vector.shape_cast %1 : vector<1x128x128xbf16> to vector<128x128xbf16>
    %c0_4 = arith.constant 0 : index
    %c0_5 = arith.constant 0 : index
    %3 = vector.load %arg3[%c0_4, %c0_5] : memref<3x128xf32, #tpu.memory_space<vmem>>, vector<1x128xf32>
    %c0_6 = arith.constant 0 : index
    %c0_7 = arith.constant 0 : index
    %4 = vector.load %arg4[%c0_6, %c0_7] : memref<3x128xf32, #tpu.memory_space<vmem>>, vector<1x128xf32>
    %c0_8 = arith.constant 0 : index
    %c0_9 = arith.constant 0 : index
    %5 = vector.load %arg5[%c0_8, %c0_9] : memref<3x128xf32, #tpu.memory_space<vmem>>, vector<1x128xf32>
    %6 = arith.truncf %0 : vector<8x128xf32> to vector<8x128xbf16>
    %cst = arith.constant dense<0.000000e+00> : vector<8x128xf32>
    %7 = tpu.matmul %6, %2, %cst {dimension_numbers = #tpu.dot_dimension_numbers<[1], [0], [0], [1], [0, 0, 1, 1], [], []>} : vector<8x128xbf16>, vector<128x128xbf16>, vector<8x128xf32> -> vector<8x128xf32>
    %8 = vector.broadcast %3 : vector<1x128xf32> to vector<8x128xf32>
    %9 = arith.addf %7, %8 : vector<8x128xf32>
    %cst_10 = arith.constant dense<0.000000e+00> : vector<8xf32>
    %10 = vector.multi_reduction <add>, %9, %cst_10 [1] : vector<8x128xf32> to vector<8xf32>
    %11 = vector.shape_cast %10 : vector<8xf32> to vector<8x1xf32>
    %cst_11 = arith.constant 3.125000e-02 : f32
    %12 = vector.broadcast %cst_11 : f32 to vector<8x1xf32>
    %13 = arith.mulf %11, %12 : vector<8x1xf32>
    %14 = vector.broadcast %13 : vector<8x1xf32> to vector<8x128xf32>
    %15 = arith.subf %9, %14 : vector<8x128xf32>
    %16 = arith.mulf %15, %15 : vector<8x128xf32>
    %cst_12 = arith.constant dense<0.000000e+00> : vector<8xf32>
    %17 = vector.multi_reduction <add>, %16, %cst_12 [1] : vector<8x128xf32> to vector<8xf32>
    %18 = vector.shape_cast %17 : vector<8xf32> to vector<8x1xf32>
    %cst_13 = arith.constant 9.600000e+01 : f32
    %19 = vector.broadcast %cst_13 : f32 to vector<8x1xf32>
    %20 = arith.mulf %19, %13 : vector<8x1xf32>
    %21 = arith.mulf %20, %13 : vector<8x1xf32>
    %22 = arith.subf %18, %21 : vector<8x1xf32>
    %cst_14 = arith.constant 3.125000e-02 : f32
    %23 = vector.broadcast %cst_14 : f32 to vector<8x1xf32>
    %24 = arith.mulf %22, %23 : vector<8x1xf32>
    %cst_15 = arith.constant 9.99999974E-6 : f32
    %25 = vector.broadcast %cst_15 : f32 to vector<8x1xf32>
    %26 = arith.addf %24, %25 : vector<8x1xf32>
    %27 = math.rsqrt %26 : vector<8x1xf32>
    %28 = vector.broadcast %27 : vector<8x1xf32> to vector<8x128xf32>
    %29 = arith.mulf %15, %28 : vector<8x128xf32>
    %30 = vector.broadcast %4 : vector<1x128xf32> to vector<8x128xf32>
    %31 = arith.mulf %29, %30 : vector<8x128xf32>
    %32 = vector.broadcast %5 : vector<1x128xf32> to vector<8x128xf32>
    %33 = arith.addf %31, %32 : vector<8x128xf32>
    %cst_16 = arith.constant 0.000000e+00 : f32
    %34 = vector.broadcast %cst_16 : f32 to vector<8x128xf32>
    %35 = arith.maximumf %33, %34 : vector<8x128xf32>
    %c1 = arith.constant 1 : index
    %c0_17 = arith.constant 0 : index
    %c0_18 = arith.constant 0 : index
    %36 = vector.load %arg2[%c1, %c0_17, %c0_18] : memref<3x128x128xbf16, #tpu.memory_space<vmem>>, vector<1x128x128xbf16>
    %37 = vector.shape_cast %36 : vector<1x128x128xbf16> to vector<128x128xbf16>
    %c1_19 = arith.constant 1 : index
    %c0_20 = arith.constant 0 : index
    %38 = vector.load %arg3[%c1_19, %c0_20] : memref<3x128xf32, #tpu.memory_space<vmem>>, vector<1x128xf32>
    %c1_21 = arith.constant 1 : index
    %c0_22 = arith.constant 0 : index
    %39 = vector.load %arg4[%c1_21, %c0_22] : memref<3x128xf32, #tpu.memory_space<vmem>>, vector<1x128xf32>
    %c1_23 = arith.constant 1 : index
    %c0_24 = arith.constant 0 : index
    %40 = vector.load %arg5[%c1_23, %c0_24] : memref<3x128xf32, #tpu.memory_space<vmem>>, vector<1x128xf32>
    %41 = arith.truncf %35 : vector<8x128xf32> to vector<8x128xbf16>
    %cst_25 = arith.constant dense<0.000000e+00> : vector<8x128xf32>
    %42 = tpu.matmul %41, %37, %cst_25 {dimension_numbers = #tpu.dot_dimension_numbers<[1], [0], [0], [1], [0, 0, 1, 1], [], []>} : vector<8x128xbf16>, vector<128x128xbf16>, vector<8x128xf32> -> vector<8x128xf32>
    %43 = vector.broadcast %38 : vector<1x128xf32> to vector<8x128xf32>
    %44 = arith.addf %42, %43 : vector<8x128xf32>
    %cst_26 = arith.constant dense<0.000000e+00> : vector<8xf32>
    %45 = vector.multi_reduction <add>, %44, %cst_26 [1] : vector<8x128xf32> to vector<8xf32>
    %46 = vector.shape_cast %45 : vector<8xf32> to vector<8x1xf32>
    %cst_27 = arith.constant 3.125000e-02 : f32
    %47 = vector.broadcast %cst_27 : f32 to vector<8x1xf32>
    %48 = arith.mulf %46, %47 : vector<8x1xf32>
    %49 = vector.broadcast %48 : vector<8x1xf32> to vector<8x128xf32>
    %50 = arith.subf %44, %49 : vector<8x128xf32>
    %51 = arith.mulf %50, %50 : vector<8x128xf32>
    %cst_28 = arith.constant dense<0.000000e+00> : vector<8xf32>
    %52 = vector.multi_reduction <add>, %51, %cst_28 [1] : vector<8x128xf32> to vector<8xf32>
    %53 = vector.shape_cast %52 : vector<8xf32> to vector<8x1xf32>
    %cst_29 = arith.constant 9.600000e+01 : f32
    %54 = vector.broadcast %cst_29 : f32 to vector<8x1xf32>
    %55 = arith.mulf %54, %48 : vector<8x1xf32>
    %56 = arith.mulf %55, %48 : vector<8x1xf32>
    %57 = arith.subf %53, %56 : vector<8x1xf32>
    %cst_30 = arith.constant 3.125000e-02 : f32
    %58 = vector.broadcast %cst_30 : f32 to vector<8x1xf32>
    %59 = arith.mulf %57, %58 : vector<8x1xf32>
    %cst_31 = arith.constant 9.99999974E-6 : f32
    %60 = vector.broadcast %cst_31 : f32 to vector<8x1xf32>
    %61 = arith.addf %59, %60 : vector<8x1xf32>
    %62 = math.rsqrt %61 : vector<8x1xf32>
    %63 = vector.broadcast %62 : vector<8x1xf32> to vector<8x128xf32>
    %64 = arith.mulf %50, %63 : vector<8x128xf32>
    %65 = vector.broadcast %39 : vector<1x128xf32> to vector<8x128xf32>
    %66 = arith.mulf %64, %65 : vector<8x128xf32>
    %67 = vector.broadcast %40 : vector<1x128xf32> to vector<8x128xf32>
    %68 = arith.addf %66, %67 : vector<8x128xf32>
    %cst_32 = arith.constant 0.000000e+00 : f32
    %69 = vector.broadcast %cst_32 : f32 to vector<8x128xf32>
    %70 = arith.maximumf %68, %69 : vector<8x128xf32>
    %c2 = arith.constant 2 : index
    %c0_33 = arith.constant 0 : index
    %c0_34 = arith.constant 0 : index
    %71 = vector.load %arg2[%c2, %c0_33, %c0_34] : memref<3x128x128xbf16, #tpu.memory_space<vmem>>, vector<1x128x128xbf16>
    %72 = vector.shape_cast %71 : vector<1x128x128xbf16> to vector<128x128xbf16>
    %c2_35 = arith.constant 2 : index
    %c0_36 = arith.constant 0 : index
    %73 = vector.load %arg3[%c2_35, %c0_36] : memref<3x128xf32, #tpu.memory_space<vmem>>, vector<1x128xf32>
    %c2_37 = arith.constant 2 : index
    %c0_38 = arith.constant 0 : index
    %74 = vector.load %arg4[%c2_37, %c0_38] : memref<3x128xf32, #tpu.memory_space<vmem>>, vector<1x128xf32>
    %c2_39 = arith.constant 2 : index
    %c0_40 = arith.constant 0 : index
    %75 = vector.load %arg5[%c2_39, %c0_40] : memref<3x128xf32, #tpu.memory_space<vmem>>, vector<1x128xf32>
    %76 = arith.truncf %70 : vector<8x128xf32> to vector<8x128xbf16>
    %cst_41 = arith.constant dense<0.000000e+00> : vector<8x128xf32>
    %77 = tpu.matmul %76, %72, %cst_41 {dimension_numbers = #tpu.dot_dimension_numbers<[1], [0], [0], [1], [0, 0, 1, 1], [], []>} : vector<8x128xbf16>, vector<128x128xbf16>, vector<8x128xf32> -> vector<8x128xf32>
    %78 = vector.broadcast %73 : vector<1x128xf32> to vector<8x128xf32>
    %79 = arith.addf %77, %78 : vector<8x128xf32>
    %cst_42 = arith.constant dense<0.000000e+00> : vector<8xf32>
    %80 = vector.multi_reduction <add>, %79, %cst_42 [1] : vector<8x128xf32> to vector<8xf32>
    %81 = vector.shape_cast %80 : vector<8xf32> to vector<8x1xf32>
    %cst_43 = arith.constant 3.125000e-02 : f32
    %82 = vector.broadcast %cst_43 : f32 to vector<8x1xf32>
    %83 = arith.mulf %81, %82 : vector<8x1xf32>
    %84 = vector.broadcast %83 : vector<8x1xf32> to vector<8x128xf32>
    %85 = arith.subf %79, %84 : vector<8x128xf32>
    %86 = arith.mulf %85, %85 : vector<8x128xf32>
    %cst_44 = arith.constant dense<0.000000e+00> : vector<8xf32>
    %87 = vector.multi_reduction <add>, %86, %cst_44 [1] : vector<8x128xf32> to vector<8xf32>
    %88 = vector.shape_cast %87 : vector<8xf32> to vector<8x1xf32>
    %cst_45 = arith.constant 9.600000e+01 : f32
    %89 = vector.broadcast %cst_45 : f32 to vector<8x1xf32>
    %90 = arith.mulf %89, %83 : vector<8x1xf32>
    %91 = arith.mulf %90, %83 : vector<8x1xf32>
    %92 = arith.subf %88, %91 : vector<8x1xf32>
    %cst_46 = arith.constant 3.125000e-02 : f32
    %93 = vector.broadcast %cst_46 : f32 to vector<8x1xf32>
    %94 = arith.mulf %92, %93 : vector<8x1xf32>
    %cst_47 = arith.constant 9.99999974E-6 : f32
    %95 = vector.broadcast %cst_47 : f32 to vector<8x1xf32>
    %96 = arith.addf %94, %95 : vector<8x1xf32>
    %97 = math.rsqrt %96 : vector<8x1xf32>
    %98 = vector.broadcast %97 : vector<8x1xf32> to vector<8x128xf32>
    %99 = arith.mulf %85, %98 : vector<8x128xf32>
    %100 = vector.broadcast %74 : vector<1x128xf32> to vector<8x128xf32>
    %101 = arith.mulf %99, %100 : vector<8x128xf32>
    %102 = vector.broadcast %75 : vector<1x128xf32> to vector<8x128xf32>
    %103 = arith.addf %101, %102 : vector<8x128xf32>
    %cst_48 = arith.constant 0.000000e+00 : f32
    %104 = vector.broadcast %cst_48 : f32 to vector<8x128xf32>
    %105 = arith.maximumf %103, %104 : vector<8x128xf32>
    %106 = arith.truncf %105 : vector<8x128xf32> to vector<8x128xbf16>
    %c0_49 = arith.constant 0 : index
    %c0_50 = arith.constant 0 : index
    %107 = vector.load %arg6[%c0_49, %c0_50] : memref<128x128xbf16, #tpu.memory_space<vmem>>, vector<128x128xbf16>
    %cst_51 = arith.constant dense<0.000000e+00> : vector<8x128xf32>
    %108 = tpu.matmul %106, %107, %cst_51 {dimension_numbers = #tpu.dot_dimension_numbers<[1], [0], [0], [1], [0, 0, 1, 1], [], []>} : vector<8x128xbf16>, vector<128x128xbf16>, vector<8x128xf32> -> vector<8x128xf32>
    %c0_52 = arith.constant 0 : index
    %c0_53 = arith.constant 0 : index
    %109 = vector.load %arg7[%c0_52, %c0_53] : memref<1x128xf32, #tpu.memory_space<vmem>>, vector<1x128xf32>
    %110 = vector.broadcast %109 : vector<1x128xf32> to vector<8x128xf32>
    %111 = arith.addf %108, %110 : vector<8x128xf32>
    %c0_54 = arith.constant 0 : index
    %c0_55 = arith.constant 0 : index
    %112 = vector.load %arg8[%c0_54, %c0_55] : memref<8x128xf32, #tpu.memory_space<vmem>>, vector<8x128xf32>
    tpu.vector_store %arg8[%c0_54, %c0_55], %111 {strides = array<i32>} : memref<8x128xf32, #tpu.memory_space<vmem>>, vector<8x128xf32>,
    return
  }
  func.func @transform_0(%arg0: i32) -> (i32, i32) {
    %c0_i32 = arith.constant 0 : i32
    %c0_i32_0 = arith.constant 0 : i32
    return %arg0, %c0_i32 : i32, i32
  }
  func.func @transform_1(%arg0: i32) -> (i32, i32, i32) {
    %c0_i32 = arith.constant 0 : i32
    %c0_i32_0 = arith.constant 0 : i32
    %c0_i32_1 = arith.constant 0 : i32
    %c0_i32_2 = arith.constant 0 : i32
    return %c0_i32, %c0_i32_0, %c0_i32_1 : i32, i32, i32
  }
  func.func @transform_2(%arg0: i32) -> (i32, i32) {
    %c0_i32 = arith.constant 0 : i32
    %c0_i32_0 = arith.constant 0 : i32
    %c0_i32_1 = arith.constant 0 : i32
    return %c0_i32, %c0_i32_0 : i32, i32
  }
  func.func @transform_3(%arg0: i32) -> (i32, i32) {
    %c0_i32 = arith.constant 0 : i32
    %c0_i32_0 = arith.constant 0 : i32
    %c0_i32_1 = arith.constant 0 : i32
    return %c0_i32, %c0_i32_0 : i32, i32
  }
  func.func @transform_4(%arg0: i32) -> (i32, i32) {
    %c0_i32 = arith.constant 0 : i32
    %c0_i32_0 = arith.constant 0 : i32
    %c0_i32_1 = arith.constant 0 : i32
    return %c0_i32, %c0_i32_0 : i32, i32
  }
  func.func @transform_5(%arg0: i32) -> (i32, i32) {
    %c0_i32 = arith.constant 0 : i32
    %c0_i32_0 = arith.constant 0 : i32
    %c0_i32_1 = arith.constant 0 : i32
    return %c0_i32, %c0_i32_0 : i32, i32
  }
  func.func @transform_6(%arg0: i32) -> (i32, i32) {
    %c0_i32 = arith.constant 0 : i32
    %c0_i32_0 = arith.constant 0 : i32
    %c0_i32_1 = arith.constant 0 : i32
    return %c0_i32, %c0_i32_0 : i32, i32
  }
  func.func @transform_7(%arg0: i32) -> (i32, i32) {
    %c0_i32 = arith.constant 0 : i32
    %c0_i32_0 = arith.constant 0 : i32
    return %arg0, %c0_i32 : i32, i32
  }
}

</mosaic_0001>

<bundles_post_ra>
// kernel: emotion_regression_forward.1
= control target key start
LH: loop header
LB: loop body
LE: loop exit
PB: predicated region body
PF: predicated region fallthrough
CT: control target
= control target key end

     0   :  { %12 = vsyncpa [#allocation3], 0  ;;  %s984_s0 = inlined_call_operand.vmem [shape: f32[8,128], index: 0, kind: input, shape index: {}]   ;;  %s985_s1 = inlined_call_operand.hbm [shape: bf16[3,128,128], index: 1, kind: input, shape index: {}]   ;;  %s986_s2 = inlined_call_operand.vmem [shape: f32[3,128], index: 2, kind: input, shape index: {}]   ;;  %s987_s3 = inlined_call_operand.vmem [shape: f32[3,128], index: 3, kind: input, shape index: {}]   ;;  %s988_s4 = inlined_call_operand.vmem [shape: f32[3,128], index: 4, kind: input, shape index: {}]   ;;  %s989_s5 = inlined_call_operand.hbm [shape: bf16[128,128], index: 5, kind: input, shape index: {}]   ;;  %s990_s6 = inlined_call_operand.vmem [shape: f32[1,128], index: 6, kind: input, shape index: {}]   ;;  %s991_s7 = inlined_call_operand.vmem [shape: f32[8,128], index: 7, kind: output, shape index: {}]  }
   0x1   :  { %13 = vsyncpa [#allocation5], 0  ;;  %s838_s24 = smov [#allocation2]   ;;  %s790_s28 = scalar_lea.hbm %s985_s1, 3072 }
   0x2   :  { %s21_s25 = sshll.u32 %s838_s24, 4  ;;  %p791_p0 = scmp.ne.s32.totalorder %s985_s1, %s790_s28  ;;  %s22_s25 = int_to_ptr.vmem [resolvable:$true] %s21_s25 }
   0x3   :  { %p794_p1 = scmp.lt.u32.totalorder %s790_s28, %s985_s1 }
   0x5   :  { %p796_p2 = pnand %p794_p1, %p791_p0 }
   0x7   :  { %799 = shalt.err (!%p796_p2)
}
   0x8   :  { %s800_s10 = scalar_lea.vmem %s22_s25, 3072  ;;  %p805_p4 = scmp.lt.s32.totalorder %s22_s25, %s22_s25 }
   0x9   :  { %p801_p3 = scmp.ne.s32.totalorder %s22_s25, %s800_s10  ;;  %p806_p5 = scmp.lt.s32.totalorder %s800_s10, %s800_s10 }
   0xb   :  { %p807_p6 = por %p806_p5, %p805_p4 }
   0xd   :  { %p808_p7 = pnand %p807_p6, %p801_p3 }
   0xf   :  { %811 = shalt.err (!%p808_p7)
}
  0x10   :  { %s839_s11 = smov 64   ;;  %s840_s12 = smov 4  }
  0x11   :  { %27 = dma.hbm_to_vmem [thread:$0]  %s985_s1, 3072, %s22_s25, [#allocation3], %s839_s11, %s839_s11, %s840_s12  }
  0x12   :  { %s841_s15 = smov [#allocation4]   ;;  %s812_s19 = scalar_lea.hbm %s989_s5, 1024 }
  0x13   :  { %s39_s16 = sshll.u32 %s841_s15, 4  ;;  %p813_p8 = scmp.ne.s32.totalorder %s989_s5, %s812_s19  ;;  %s40_s16 = int_to_ptr.vmem [resolvable:$true] %s39_s16 }
  0x14   :  { %p816_p9 = scmp.lt.u32.totalorder %s812_s19, %s989_s5 }
  0x16   :  { %p818_p10 = pnand %p816_p9, %p813_p8 }
  0x18   :  { %821 = shalt.err (!%p818_p10)
}
  0x19   :  { %s822_s24 = scalar_lea.vmem %s40_s16, 1024  ;;  %p827_p12 = scmp.lt.s32.totalorder %s40_s16, %s40_s16 }
  0x1a   :  { %p823_p11 = scmp.ne.s32.totalorder %s40_s16, %s822_s24  ;;  %p828_p13 = scmp.lt.s32.totalorder %s822_s24, %s822_s24 }
  0x1c   :  { %p829_p0 = por %p828_p13, %p827_p12 }
  0x1e   :  { %p830_p1 = pnand %p829_p0, %p823_p11 }
  0x20   :  { %833 = shalt.err (!%p830_p1)
}
  0x21   :  { %45 = dma.hbm_to_vmem [thread:$0]  %s989_s5, 1024, %s40_s16, [#allocation5], %s839_s11, %s839_s11, %s840_s12  }
  0x22   :  { %834 = dma.done.wait [#allocation3], 3072  }
  0x23   :  { %835 = vsyncadd [#allocation3], 4294964224 }
  0x24   :  { %836 = dma.done.wait [#allocation5], 1024  }
  0x25   :  { %837 = vsyncadd [#allocation5], 4294966272  ;;  %v842_v0 = vmov 0.0   ;;  %vm843_vm0 = vmmov 0   ;;  %v752_v1 = vld [vmem:[#allocation2] sm:$0xff]   ;;  %v753_v2 = vld [vmem:[#allocation2 + $0x8] sm:$0xff]  }
  0x26   :  { %666 = vmatprep.subr.bf16.mxu0 %v842_v0  ;;  %682 = vmatprep.mubr.msk.bf16.mxu0 %vm843_vm0, %v842_v0  ;;  %v754_v3 = vld [vmem:[#allocation2 + $0x10] sm:$0xff]   ;;  %v755_v4 = vld [vmem:[#allocation2 + $0x18] sm:$0xff]   ;;  %v756_v5 = vld [vmem:[#allocation2 + $0x20] sm:$0xff]  }
  0x27   :  { %686 = vmatprep.subr.bf16.mxu1 %v842_v0  ;;  %702 = vmatprep.mubr.msk.bf16.mxu1 %vm843_vm0, %v842_v0  ;;  %v757_v6 = vld [vmem:[#allocation2 + $0x28] sm:$0xff]   ;;  %v758_v7 = vld [vmem:[#allocation2 + $0x30] sm:$0xff]   ;;  %v759_v8 = vld [vmem:[#allocation2 + $0x38] sm:$0xff]  }
  0x28   :  { %667 = vmatpush3.bf16.msra.mxu0 %v752_v1  ;;  %v55_v9 = vld [vmem:[%s984_s0] sm:$0xff]  ;;  %v761_v22 = vld [vmem:[#allocation2 + $0x48] sm:$0xff]   ;;  %v762_v23 = vld [vmem:[#allocation2 + $0x50] sm:$0xff]  }
  0x29   :  { %668 = vmatprep.subr.bf16.mxu0 %v842_v0  ;;  %v75_v10 = vpack.c.bf16 %v55_v9, %v55_v9  ;;  %v588_v11 = vld [vmem:[%s986_s2] ss:$0 sm:$0xff]  ;;  %v763_v24 = vld [vmem:[#allocation2 + $0x58] sm:$0xff]   ;;  %v765_v26 = vld [vmem:[#allocation2 + $0x68] sm:$0xff]  }
  0x2a   :  { %v760_v17 = vld [vmem:[#allocation2 + $0x40] sm:$0xff]   ;;  %v766_v27 = vld [vmem:[#allocation2 + $0x70] sm:$0xff]   ;;  %v767_v28 = vld [vmem:[#allocation2 + $0x78] sm:$0xff]  }
  0x2b   :  { %687 = vmatpush3.bf16.msra.mxu1 %v760_v17  ;;  %v764_v25 = vld [vmem:[#allocation2 + $0x60] sm:$0xff]   ;;  %v769_v54 = vld [vmem:[#allocation2 + $0x88] sm:$0xff]   ;;  %v770_v55 = vld [vmem:[#allocation2 + $0x90] sm:$0xff]  }
  0x2c   :  { %669 = vmatpush3.bf16.msra.mxu0 %v753_v2  ;;  %688 = vmatprep.subr.bf16.mxu1 %v842_v0  ;;  %v597_v36 = vld [vmem:[%s987_s3] ss:$0 sm:$0xff]  ;;  %v599_v43 = vld [vmem:[%s986_s2 + $0x1] ss:$0 sm:$0xff]  ;;  %v771_v56 = vld [vmem:[#allocation2 + $0x98] sm:$0xff]  }
  0x2d   :  { %670 = vmatprep.subr.bf16.mxu0 %v842_v0  ;;  %v598_v38 = vld [vmem:[%s988_s4] ss:$0 sm:$0xff]  ;;  %v773_v58 = vld [vmem:[#allocation2 + $0xa8] sm:$0xff]   ;;  %v774_v59 = vld [vmem:[#allocation2 + $0xb0] sm:$0xff]  }
  0x2e   :  { %v768_v49 = vld [vmem:[#allocation2 + $0x80] sm:$0xff]   ;;  %v775_v60 = vld [vmem:[#allocation2 + $0xb8] sm:$0xff]  }
  0x2f   :  { %689 = vmatpush3.bf16.msra.mxu1 %v761_v22  ;;  %v772_v57 = vld [vmem:[#allocation2 + $0xa0] sm:$0xff]  }
  0x30   :  { %671 = vmatpush3.bf16.msra.mxu0 %v754_v3  ;;  %690 = vmatprep.subr.bf16.mxu1 %v842_v0 }
  0x31   :  { %672 = vmatprep.subr.bf16.mxu0 %v842_v0 }
  0x33   :  { %691 = vmatpush3.bf16.msra.mxu1 %v762_v23  ;;  %v777_v23 = vld [vmem:[#allocation4 + $0x8] sm:$0xff]  }
  0x34   :  { %673 = vmatpush3.bf16.msra.mxu0 %v755_v4  ;;  %692 = vmatprep.subr.bf16.mxu1 %v842_v0 }
  0x35   :  { %674 = vmatprep.subr.bf16.mxu0 %v842_v0 }
  0x37   :  { %693 = vmatpush3.bf16.msra.mxu1 %v763_v24  ;;  %v778_v24 = vld [vmem:[#allocation4 + $0x10] sm:$0xff]  }
  0x38   :  { %675 = vmatpush3.bf16.msra.mxu0 %v756_v5  ;;  %694 = vmatprep.subr.bf16.mxu1 %v842_v0  ;;  %v608_v5 = vld [vmem:[%s987_s3 + $0x1] ss:$0 sm:$0xff] }
  0x39   :  { %676 = vmatprep.subr.bf16.mxu0 %v842_v0 }
  0x3b   :  { %695 = vmatpush3.bf16.msra.mxu1 %v764_v25  ;;  %v779_v25 = vld [vmem:[#allocation4 + $0x18] sm:$0xff]  }
  0x3c   :  { %677 = vmatpush3.bf16.msra.mxu0 %v757_v6  ;;  %696 = vmatprep.subr.bf16.mxu1 %v842_v0 }
  0x3d   :  { %678 = vmatprep.subr.bf16.mxu0 %v842_v0 }
  0x3f   :  { %697 = vmatpush3.bf16.msra.mxu1 %v765_v26  ;;  %v780_v26 = vld [vmem:[#allocation4 + $0x20] sm:$0xff]  }
  0x40   :  { %679 = vmatpush3.bf16.msra.mxu0 %v758_v7  ;;  %698 = vmatprep.subr.bf16.mxu1 %v842_v0  ;;  %v609_v7 = vld [vmem:[%s988_s4 + $0x1] ss:$0 sm:$0xff] }
  0x41   :  { %680 = vmatprep.subr.bf16.mxu0 %v842_v0 }
  0x43   :  { %699 = vmatpush3.bf16.msra.mxu1 %v766_v27  ;;  %v781_v27 = vld [vmem:[#allocation4 + $0x28] sm:$0xff]  }
  0x44   :  { %681 = vmatpush3.bf16.msra.mxu0 %v759_v8  ;;  %700 = vmatprep.subr.bf16.mxu1 %v842_v0 }
  0x45   :  { %706 = vmatprep.subr.bf16.mxu0 %v842_v0 }
  0x47   :  { %683 = vmatmul.mubr.bf16.vlgmr.msra.gmra.mrb[0].mxu0 %v75_v10  ;;  %701 = vmatpush3.bf16.msra.mxu1 %v767_v28  ;;  %v782_v28 = vld [vmem:[#allocation4 + $0x30] sm:$0xff]  }
  0x48   :  { %722 = vmatprep.mubr.msk.bf16.mxu0 %vm843_vm0, %v842_v0  ;;  %726 = vmatprep.subr.bf16.mxu1 %v842_v0 }
  0x49   :  { %707 = vmatpush3.bf16.msra.mxu0 %v768_v49 }
  0x4a   :  { %708 = vmatprep.subr.bf16.mxu0 %v842_v0 }
  0x4d   :  { %709 = vmatpush3.bf16.msra.mxu0 %v769_v54 }
  0x4e   :  { %710 = vmatprep.subr.bf16.mxu0 %v842_v0 }
  0x51   :  { %711 = vmatpush3.bf16.msra.mxu0 %v770_v55 }
  0x52   :  { %712 = vmatprep.subr.bf16.mxu0 %v842_v0 }
  0x55   :  { %713 = vmatpush3.bf16.msra.mxu0 %v771_v56 }
  0x56   :  { %714 = vmatprep.subr.bf16.mxu0 %v842_v0 }
  0x59   :  { %715 = vmatpush3.bf16.msra.mxu0 %v772_v57 }
  0x5a   :  { %716 = vmatprep.subr.bf16.mxu0 %v842_v0 }
  0x5d   :  { %717 = vmatpush3.bf16.msra.mxu0 %v773_v58 }
  0x5e   :  { %718 = vmatprep.subr.bf16.mxu0 %v842_v0 }
  0x61   :  { %719 = vmatpush3.bf16.msra.mxu0 %v774_v59 }
  0x62   :  { %720 = vmatprep.subr.bf16.mxu0 %v842_v0 }
  0x65   :  { %721 = vmatpush3.bf16.msra.mxu0 %v775_v60 }
 0x11a   :  { %v162_v12 = vpop.f32.mrb[0].mxu0 }
 0x11b   :  { %v163_v13 = vadd.f32 %v588_v11, %v162_v12  ;;  %v684_v14 = vpop.f32.mrb[1].mxu0  ;;  %v610_v12 = vld [vmem:[%s986_s2 + $0x2] ss:$0 sm:$0xff] }
 0x11c   :  { %v165_v15 = vpop.f32.mrb[2].mxu0 }
 0x11d   :  { %168 = vadd.xlane.f32.xlu0 %v163_v13  ;;  %v685_v16 = vpop.f32.mrb[3].mxu0 }
 0x1aa   :  { %v169_v18 = vpop.xlane.xlu0 %168 }
 0x1ab   :  { %v170_v19 = vmul.f32 0.03125, %v169_v18  ;;  %v776_v18 = vld [vmem:[#allocation4] sm:$0xff]  }
 0x1ad   :  { %v171_v20 = vsub.f32 %v163_v13, %v170_v19  ;;  %v175_v29 = vmul.f32 96.0, %v170_v19 }
 0x1af   :  { %v172_v21 = vmul.f32 %v171_v20, %v171_v20  ;;  %v176_v30 = vmul.f32 %v175_v29, %v170_v19  ;;  %v783_v29 = vld [vmem:[#allocation4 + $0x38] sm:$0xff]  }
 0x1b1   :  { %173 = vadd.xlane.f32.xlu0 %v172_v21 }
 0x23e   :  { %v174_v31 = vpop.xlane.xlu0 %173 }
 0x23f   :  { %v177_v32 = vsub.f32 %v174_v31, %v176_v30 }
 0x241   :  { %v178_v33 = vmul.f32 0.03125, %v177_v32 }
 0x243   :  { %v179_v34 = vadd.f32 1e-05, %v178_v33 }
 0x245   :  { %784 = vrsqrt.f32 %v179_v34 }
 0x24f   :  { %v785_v35 = vpop.eup %784 }
 0x250   :  { %v181_v37 = vmul.f32 %v785_v35, %v171_v20 }
 0x252   :  { %v186_v39 = vmul.f32 %v597_v36, %v181_v37  ;;  %v619_v37 = vld [vmem:[%s987_s3 + $0x2] ss:$0 sm:$0xff] }
 0x254   :  { %v191_v40 = vadd.f32 %v598_v38, %v186_v39  ;;  %v620_v39 = vld [vmem:[%s988_s4 + $0x2] ss:$0 sm:$0xff] }
 0x256   :  { %v192_v41 = vmax.f32 %v191_v40, 0.0 }
 0x258   :  { %v213_v42 = vpack.c.bf16 %v192_v41, %v192_v41 }
 0x25a   :  { %703 = vmatmul.mubr.bf16.vlgmr.msra.gmra.mrb[0].mxu1 %v213_v42 }
 0x25b   :  { %742 = vmatprep.mubr.msk.bf16.mxu1 %vm843_vm0, %v842_v0  ;;  %727 = vmatpush3.bf16.msra.mxu1 %v776_v18 }
 0x25c   :  { %728 = vmatprep.subr.bf16.mxu1 %v842_v0 }
 0x25f   :  { %729 = vmatpush3.bf16.msra.mxu1 %v777_v23 }
 0x260   :  { %730 = vmatprep.subr.bf16.mxu1 %v842_v0 }
 0x263   :  { %731 = vmatpush3.bf16.msra.mxu1 %v778_v24 }
 0x264   :  { %732 = vmatprep.subr.bf16.mxu1 %v842_v0 }
 0x267   :  { %733 = vmatpush3.bf16.msra.mxu1 %v779_v25 }
 0x268   :  { %734 = vmatprep.subr.bf16.mxu1 %v842_v0 }
 0x26b   :  { %735 = vmatpush3.bf16.msra.mxu1 %v780_v26 }
 0x26c   :  { %736 = vmatprep.subr.bf16.mxu1 %v842_v0 }
 0x26f   :  { %737 = vmatpush3.bf16.msra.mxu1 %v781_v27 }
 0x270   :  { %738 = vmatprep.subr.bf16.mxu1 %v842_v0 }
 0x273   :  { %739 = vmatpush3.bf16.msra.mxu1 %v782_v28 }
 0x274   :  { %740 = vmatprep.subr.bf16.mxu1 %v842_v0 }
 0x277   :  { %741 = vmatpush3.bf16.msra.mxu1 %v783_v29 }
 0x32d   :  { %v300_v44 = vpop.f32.mrb[0].mxu1 }
 0x32e   :  { %v301_v45 = vadd.f32 %v599_v43, %v300_v44  ;;  %v704_v46 = vpop.f32.mrb[1].mxu1  ;;  %v621_v43 = vld [vmem:[%s990_s6] ss:$0 sm:$0xff] }
 0x32f   :  { %v303_v47 = vpop.f32.mrb[2].mxu1 }
 0x330   :  { %306 = vadd.xlane.f32.xlu1 %v301_v45  ;;  %v705_v48 = vpop.f32.mrb[3].mxu1 }
 0x3bd   :  { %v307_v50 = vpop.xlane.xlu1 %306 }
 0x3be   :  { %v308_v51 = vmul.f32 0.03125, %v307_v50 }
 0x3c0   :  { %v309_v52 = vsub.f32 %v301_v45, %v308_v51  ;;  %v313_v61 = vmul.f32 96.0, %v308_v51 }
 0x3c2   :  { %v310_v53 = vmul.f32 %v309_v52, %v309_v52  ;;  %v314_v62 = vmul.f32 %v313_v61, %v308_v51 }
 0x3c4   :  { %311 = vadd.xlane.f32.xlu1 %v310_v53 }
 0x451   :  { %v312_v63 = vpop.xlane.xlu1 %311 }
 0x452   :  { %v315_v1 = vsub.f32 %v312_v63, %v314_v62 }
 0x454   :  { %v316_v2 = vmul.f32 0.03125, %v315_v1 }
 0x456   :  { %v317_v3 = vadd.f32 1e-05, %v316_v2 }
 0x458   :  { %786 = vrsqrt.f32 %v317_v3 }
 0x462   :  { %v787_v4 = vpop.eup %786 }
 0x463   :  { %v319_v6 = vmul.f32 %v787_v4, %v309_v52 }
 0x465   :  { %v324_v8 = vmul.f32 %v608_v5, %v319_v6 }
 0x467   :  { %v329_v9 = vadd.f32 %v609_v7, %v324_v8 }
 0x469   :  { %v330_v10 = vmax.f32 %v329_v9, 0.0 }
 0x46b   :  { %v351_v11 = vpack.c.bf16 %v330_v10, %v330_v10 }
 0x46d   :  { %723 = vmatmul.mubr.bf16.vlgmr.msra.gmra.mrb[4].mxu0 %v351_v11 }
 0x540   :  { %v438_v13 = vpop.f32.mrb[4].mxu0 }
 0x541   :  { %v439_v14 = vadd.f32 %v610_v12, %v438_v13  ;;  %v724_v15 = vpop.f32.mrb[5].mxu0 }
 0x542   :  { %v441_v16 = vpop.f32.mrb[6].mxu0 }
 0x543   :  { %444 = vadd.xlane.f32.xlu0 %v439_v14  ;;  %v725_v17 = vpop.f32.mrb[7].mxu0 }
 0x5d0   :  { %v445_v19 = vpop.xlane.xlu0 %444 }
 0x5d1   :  { %v446_v20 = vmul.f32 0.03125, %v445_v19 }
 0x5d3   :  { %v447_v21 = vsub.f32 %v439_v14, %v446_v20  ;;  %v451_v30 = vmul.f32 96.0, %v446_v20 }
 0x5d5   :  { %v448_v22 = vmul.f32 %v447_v21, %v447_v21  ;;  %v452_v31 = vmul.f32 %v451_v30, %v446_v20 }
 0x5d7   :  { %449 = vadd.xlane.f32.xlu1 %v448_v22 }
 0x664   :  { %v450_v32 = vpop.xlane.xlu1 %449 }
 0x665   :  { %v453_v33 = vsub.f32 %v450_v32, %v452_v31 }
 0x667   :  { %v454_v34 = vmul.f32 0.03125, %v453_v33 }
 0x669   :  { %v455_v35 = vadd.f32 1e-05, %v454_v34 }
 0x66b   :  { %788 = vrsqrt.f32 %v455_v35 }
 0x675   :  { %v789_v36 = vpop.eup %788 }
 0x676   :  { %v457_v38 = vmul.f32 %v789_v36, %v447_v21 }
 0x678   :  { %v462_v40 = vmul.f32 %v619_v37, %v457_v38 }
 0x67a   :  { %v467_v0 = vadd.f32 %v620_v39, %v462_v40 }
 0x67c   :  { %v468_v41 = vmax.f32 %v467_v0, 0.0 }
 0x67e   :  { %v469_v42 = vpack.c.bf16 %v468_v41, %v468_v41 }
 0x680   :  { %743 = vmatmul.mubr.bf16.vlgmr.msra.gmra.mrb[4].mxu1 %v469_v42 }
 0x753   :  { %v575_v44 = vpop.f32.mrb[4].mxu1 }
 0x754   :  { %v576_v45 = vadd.f32 %v621_v43, %v575_v44  ;;  %v744_v46 = vpop.f32.mrb[5].mxu1 }
 0x755   :  { %v578_v47 = vpop.f32.mrb[6].mxu1 }
 0x756   :  { %581 = vst [vmem:[%s991_s7] sm:$0xff] %v576_v45  ;;  %v745_v48 = vpop.f32.mrb[7].mxu1 }
 0x757   :  { %586 = vsyncpa [#allocation3], 1 }
 0x758   :  { %587 = vsyncpa [#allocation5], 1 }

// kernel: emotion_regression_forward.1
= control target key start
LH: loop header
LB: loop body
LE: loop exit
PB: predicated region body
PF: predicated region fallthrough
CT: control target
= control target key end

     0   :  { %12 = vsyncpa [#allocation3], 0  ;;  %s984_s0 = inlined_call_operand.vmem [shape: f32[8,128], index: 0, kind: input, shape index: {}]   ;;  %s985_s1 = inlined_call_operand.hbm [shape: bf16[3,128,128], index: 1, kind: input, shape index: {}]   ;;  %s986_s2 = inlined_call_operand.vmem [shape: f32[3,128], index: 2, kind: input, shape index: {}]   ;;  %s987_s3 = inlined_call_operand.vmem [shape: f32[3,128], index: 3, kind: input, shape index: {}]   ;;  %s988_s4 = inlined_call_operand.vmem [shape: f32[3,128], index: 4, kind: input, shape index: {}]   ;;  %s989_s5 = inlined_call_operand.hbm [shape: bf16[128,128], index: 5, kind: input, shape index: {}]   ;;  %s990_s6 = inlined_call_operand.vmem [shape: f32[1,128], index: 6, kind: input, shape index: {}]   ;;  %s991_s7 = inlined_call_operand.vmem [shape: f32[8,128], index: 7, kind: output, shape index: {}]  }
   0x1   :  { %13 = vsyncpa [#allocation5], 0  ;;  %s838_s24 = smov [#allocation2]   ;;  %s790_s28 = scalar_lea.hbm %s985_s1, 3072 }
   0x2   :  { %s21_s25 = sshll.u32 %s838_s24, 4  ;;  %p791_p0 = scmp.ne.s32.totalorder %s985_s1, %s790_s28  ;;  %s22_s25 = int_to_ptr.vmem [resolvable:$true] %s21_s25 }
   0x3   :  { %p794_p1 = scmp.lt.u32.totalorder %s790_s28, %s985_s1 }
   0x5   :  { %p796_p2 = pnand %p794_p1, %p791_p0 }
   0x7   :  { %799 = shalt.err (!%p796_p2)
}
   0x8   :  { %s800_s10 = scalar_lea.vmem %s22_s25, 3072  ;;  %p805_p4 = scmp.lt.s32.totalorder %s22_s25, %s22_s25 }
   0x9   :  { %p801_p3 = scmp.ne.s32.totalorder %s22_s25, %s800_s10  ;;  %p806_p5 = scmp.lt.s32.totalorder %s800_s10, %s800_s10 }
   0xb   :  { %p807_p6 = por %p806_p5, %p805_p4 }
   0xd   :  { %p808_p7 = pnand %p807_p6, %p801_p3 }
   0xf   :  { %811 = shalt.err (!%p808_p7)
}
  0x10   :  { %s839_s11 = smov 64   ;;  %s840_s12 = smov 4  }
  0x11   :  { %27 = dma.hbm_to_vmem [thread:$0]  %s985_s1, 3072, %s22_s25, [#allocation3], %s839_s11, %s839_s11, %s840_s12  }
  0x12   :  { %s841_s15 = smov [#allocation4]   ;;  %s812_s19 = scalar_lea.hbm %s989_s5, 1024 }
  0x13   :  { %s39_s16 = sshll.u32 %s841_s15, 4  ;;  %p813_p8 = scmp.ne.s32.totalorder %s989_s5, %s812_s19  ;;  %s40_s16 = int_to_ptr.vmem [resolvable:$true] %s39_s16 }
  0x14   :  { %p816_p9 = scmp.lt.u32.totalorder %s812_s19, %s989_s5 }
  0x16   :  { %p818_p10 = pnand %p816_p9, %p813_p8 }
  0x18   :  { %821 = shalt.err (!%p818_p10)
}
  0x19   :  { %s822_s24 = scalar_lea.vmem %s40_s16, 1024  ;;  %p827_p12 = scmp.lt.s32.totalorder %s40_s16, %s40_s16 }
  0x1a   :  { %p823_p11 = scmp.ne.s32.totalorder %s40_s16, %s822_s24  ;;  %p828_p13 = scmp.lt.s32.totalorder %s822_s24, %s822_s24 }
  0x1c   :  { %p829_p0 = por %p828_p13, %p827_p12 }
  0x1e   :  { %p830_p1 = pnand %p829_p0, %p823_p11 }
  0x20   :  { %833 = shalt.err (!%p830_p1)
}
  0x21   :  { %45 = dma.hbm_to_vmem [thread:$0]  %s989_s5, 1024, %s40_s16, [#allocation5], %s839_s11, %s839_s11, %s840_s12  }
  0x22   :  { %834 = dma.done.wait [#allocation3], 3072  }
  0x23   :  { %835 = vsyncadd [#allocation3], 4294964224 }
  0x24   :  { %836 = dma.done.wait [#allocation5], 1024  }
  0x25   :  { %837 = vsyncadd [#allocation5], 4294966272  ;;  %v842_v0 = vmov 0.0   ;;  %vm843_vm0 = vmmov 0   ;;  %v752_v1 = vld [vmem:[#allocation2] sm:$0xff]   ;;  %v753_v2 = vld [vmem:[#allocation2 + $0x8] sm:$0xff]  }
  0x26   :  { %666 = vmatprep.subr.bf16.mxu0 %v842_v0  ;;  %682 = vmatprep.mubr.msk.bf16.mxu0 %vm843_vm0, %v842_v0  ;;  %v754_v3 = vld [vmem:[#allocation2 + $0x10] sm:$0xff]   ;;  %v755_v4 = vld [vmem:[#allocation2 + $0x18] sm:$0xff]   ;;  %v756_v5 = vld [vmem:[#allocation2 + $0x20] sm:$0xff]  }
  0x27   :  { %686 = vmatprep.subr.bf16.mxu1 %v842_v0  ;;  %702 = vmatprep.mubr.msk.bf16.mxu1 %vm843_vm0, %v842_v0  ;;  %v757_v6 = vld [vmem:[#allocation2 + $0x28] sm:$0xff]   ;;  %v758_v7 = vld [vmem:[#allocation2 + $0x30] sm:$0xff]   ;;  %v759_v8 = vld [vmem:[#allocation2 + $0x38] sm:$0xff]  }
  0x28   :  { %667 = vmatpush3.bf16.msra.mxu0 %v752_v1  ;;  %v55_v9 = vld [vmem:[%s984_s0] sm:$0xff]  ;;  %v761_v22 = vld [vmem:[#allocation2 + $0x48] sm:$0xff]   ;;  %v762_v23 = vld [vmem:[#allocation2 + $0x50] sm:$0xff]  }
  0x29   :  { %668 = vmatprep.subr.bf16.mxu0 %v842_v0  ;;  %v75_v10 = vpack.c.bf16 %v55_v9, %v55_v9  ;;  %v588_v11 = vld [vmem:[%s986_s2] ss:$0 sm:$0xff]  ;;  %v763_v24 = vld [vmem:[#allocation2 + $0x58] sm:$0xff]   ;;  %v765_v26 = vld [vmem:[#allocation2 + $0x68] sm:$0xff]  }
  0x2a   :  { %v760_v17 = vld [vmem:[#allocation2 + $0x40] sm:$0xff]   ;;  %v766_v27 = vld [vmem:[#allocation2 + $0x70] sm:$0xff]   ;;  %v767_v28 = vld [vmem:[#allocation2 + $0x78] sm:$0xff]  }
  0x2b   :  { %687 = vmatpush3.bf16.msra.mxu1 %v760_v17  ;;  %v764_v25 = vld [vmem:[#allocation2 + $0x60] sm:$0xff]   ;;  %v769_v54 = vld [vmem:[#allocation2 + $0x88] sm:$0xff]   ;;  %v770_v55 = vld [vmem:[#allocation2 + $0x90] sm:$0xff]  }
  0x2c   :  { %669 = vmatpush3.bf16.msra.mxu0 %v753_v2  ;;  %688 = vmatprep.subr.bf16.mxu1 %v842_v0  ;;  %v597_v36 = vld [vmem:[%s987_s3] ss:$0 sm:$0xff]  ;;  %v599_v43 = vld [vmem:[%s986_s2 + $0x1] ss:$0 sm:$0xff]  ;;  %v771_v56 = vld [vmem:[#allocation2 + $0x98] sm:$0xff]  }
  0x2d   :  { %670 = vmatprep.subr.bf16.mxu0 %v842_v0  ;;  %v598_v38 = vld [vmem:[%s988_s4] ss:$0 sm:$0xff]  ;;  %v773_v58 = vld [vmem:[#allocation2 + $0xa8] sm:$0xff]   ;;  %v774_v59 = vld [vmem:[#allocation2 + $0xb0] sm:$0xff]  }
  0x2e   :  { %v768_v49 = vld [vmem:[#allocation2 + $0x80] sm:$0xff]   ;;  %v775_v60 = vld [vmem:[#allocation2 + $0xb8] sm:$0xff]  }
  0x2f   :  { %689 = vmatpush3.bf16.msra.mxu1 %v761_v22  ;;  %v772_v57 = vld [vmem:[#allocation2 + $0xa0] sm:$0xff]  }
  0x30   :  { %671 = vmatpush3.bf16.msra.mxu0 %v754_v3  ;;  %690 = vmatprep.subr.bf16.mxu1 %v842_v0 }
  0x31   :  { %672 = vmatprep.subr.bf16.mxu0 %v842_v0 }
  0x33   :  { %691 = vmatpush3.bf16.msra.mxu1 %v762_v23  ;;  %v777_v23 = vld [vmem:[#allocation4 + $0x8] sm:$0xff]  }
  0x34   :  { %673 = vmatpush3.bf16.msra.mxu0 %v755_v4  ;;  %692 = vmatprep.subr.bf16.mxu1 %v842_v0 }
  0x35   :  { %674 = vmatprep.subr.bf16.mxu0 %v842_v0 }
  0x37   :  { %693 = vmatpush3.bf16.msra.mxu1 %v763_v24  ;;  %v778_v24 = vld [vmem:[#allocation4 + $0x10] sm:$0xff]  }
  0x38   :  { %675 = vmatpush3.bf16.msra.mxu0 %v756_v5  ;;  %694 = vmatprep.subr.bf16.mxu1 %v842_v0  ;;  %v608_v5 = vld [vmem:[%s987_s3 + $0x1] ss:$0 sm:$0xff] }
  0x39   :  { %676 = vmatprep.subr.bf16.mxu0 %v842_v0 }
  0x3b   :  { %695 = vmatpush3.bf16.msra.mxu1 %v764_v25  ;;  %v779_v25 = vld [vmem:[#allocation4 + $0x18] sm:$0xff]  }
  0x3c   :  { %677 = vmatpush3.bf16.msra.mxu0 %v757_v6  ;;  %696 = vmatprep.subr.bf16.mxu1 %v842_v0 }
  0x3d   :  { %678 = vmatprep.subr.bf16.mxu0 %v842_v0 }
  0x3f   :  { %697 = vmatpush3.bf16.msra.mxu1 %v765_v26  ;;  %v780_v26 = vld [vmem:[#allocation4 + $0x20] sm:$0xff]  }
  0x40   :  { %679 = vmatpush3.bf16.msra.mxu0 %v758_v7  ;;  %698 = vmatprep.subr.bf16.mxu1 %v842_v0  ;;  %v609_v7 = vld [vmem:[%s988_s4 + $0x1] ss:$0 sm:$0xff] }
  0x41   :  { %680 = vmatprep.subr.bf16.mxu0 %v842_v0 }
  0x43   :  { %699 = vmatpush3.bf16.msra.mxu1 %v766_v27  ;;  %v781_v27 = vld [vmem:[#allocation4 + $0x28] sm:$0xff]  }
  0x44   :  { %681 = vmatpush3.bf16.msra.mxu0 %v759_v8  ;;  %700 = vmatprep.subr.bf16.mxu1 %v842_v0 }
  0x45   :  { %706 = vmatprep.subr.bf16.mxu0 %v842_v0 }
  0x47   :  { %683 = vmatmul.mubr.bf16.vlgmr.msra.gmra.mrb[0].mxu0 %v75_v10  ;;  %701 = vmatpush3.bf16.msra.mxu1 %v767_v28  ;;  %v782_v28 = vld [vmem:[#allocation4 + $0x30] sm:$0xff]  }
  0x48   :  { %722 = vmatprep.mubr.msk.bf16.mxu0 %vm843_vm0, %v842_v0  ;;  %726 = vmatprep.subr.bf16.mxu1 %v842_v0 }
  0x49   :  { %707 = vmatpush3.bf16.msra.mxu0 %v768_v49 }
  0x4a   :  { %708 = vmatprep.subr.bf16.mxu0 %v842_v0 }
  0x4d   :  { %709 = vmatpush3.bf16.msra.mxu0 %v769_v54 }
  0x4e   :  { %710 = vmatprep.subr.bf16.mxu0 %v842_v0 }
  0x51   :  { %711 = vmatpush3.bf16.msra.mxu0 %v770_v55 }
  0x52   :  { %712 = vmatprep.subr.bf16.mxu0 %v842_v0 }
  0x55   :  { %713 = vmatpush3.bf16.msra.mxu0 %v771_v56 }
  0x56   :  { %714 = vmatprep.subr.bf16.mxu0 %v842_v0 }
  0x59   :  { %715 = vmatpush3.bf16.msra.mxu0 %v772_v57 }
  0x5a   :  { %716 = vmatprep.subr.bf16.mxu0 %v842_v0 }
  0x5d   :  { %717 = vmatpush3.bf16.msra.mxu0 %v773_v58 }
  0x5e   :  { %718 = vmatprep.subr.bf16.mxu0 %v842_v0 }
  0x61   :  { %719 = vmatpush3.bf16.msra.mxu0 %v774_v59 }
  0x62   :  { %720 = vmatprep.subr.bf16.mxu0 %v842_v0 }
  0x65   :  { %721 = vmatpush3.bf16.msra.mxu0 %v775_v60 }
 0x11a   :  { %v162_v12 = vpop.f32.mrb[0].mxu0 }
 0x11b   :  { %v163_v13 = vadd.f32 %v588_v11, %v162_v12  ;;  %v684_v14 = vpop.f32.mrb[1].mxu0  ;;  %v610_v12 = vld [vmem:[%s986_s2 + $0x2] ss:$0 sm:$0xff] }
 0x11c   :  { %v165_v15 = vpop.f32.mrb[2].mxu0 }
 0x11d   :  { %168 = vadd.xlane.f32.xlu0 %v163_v13  ;;  %v685_v16 = vpop.f32.mrb[3].mxu0 }
 0x1aa   :  { %v169_v18 = vpop.xlane.xlu0 %168 }
 0x1ab   :  { %v170_v19 = vmul.f32 0.03125, %v169_v18  ;;  %v776_v18 = vld [vmem:[#allocation4] sm:$0xff]  }
 0x1ad   :  { %v171_v20 = vsub.f32 %v163_v13, %v170_v19  ;;  %v175_v29 = vmul.f32 96.0, %v170_v19 }
 0x1af   :  { %v172_v21 = vmul.f32 %v171_v20, %v171_v20  ;;  %v176_v30 = vmul.f32 %v175_v29, %v170_v19  ;;  %v783_v29 = vld [vmem:[#allocation4 + $0x38] sm:$0xff]  }
 0x1b1   :  { %173 = vadd.xlane.f32.xlu0 %v172_v21 }
 0x23e   :  { %v174_v31 = vpop.xlane.xlu0 %173 }
 0x23f   :  { %v177_v32 = vsub.f32 %v174_v31, %v176_v30 }
 0x241   :  { %v178_v33 = vmul.f32 0.03125, %v177_v32 }
 0x243   :  { %v179_v34 = vadd.f32 1e-05, %v178_v33 }
 0x245   :  { %784 = vrsqrt.f32 %v179_v34 }
 0x24f   :  { %v785_v35 = vpop.eup %784 }
 0x250   :  { %v181_v37 = vmul.f32 %v785_v35, %v171_v20 }
 0x252   :  { %v186_v39 = vmul.f32 %v597_v36, %v181_v37  ;;  %v619_v37 = vld [vmem:[%s987_s3 + $0x2] ss:$0 sm:$0xff] }
 0x254   :  { %v191_v40 = vadd.f32 %v598_v38, %v186_v39  ;;  %v620_v39 = vld [vmem:[%s988_s4 + $0x2] ss:$0 sm:$0xff] }
 0x256   :  { %v192_v41 = vmax.f32 %v191_v40, 0.0 }
 0x258   :  { %v213_v42 = vpack.c.bf16 %v192_v41, %v192_v41 }
 0x25a   :  { %703 = vmatmul.mubr.bf16.vlgmr.msra.gmra.mrb[0].mxu1 %v213_v42 }
 0x25b   :  { %742 = vmatprep.mubr.msk.bf16.mxu1 %vm843_vm0, %v842_v0  ;;  %727 = vmatpush3.bf16.msra.mxu1 %v776_v18 }
 0x25c   :  { %728 = vmatprep.subr.bf16.mxu1 %v842_v0 }
 0x25f   :  { %729 = vmatpush3.bf16.msra.mxu1 %v777_v23 }
 0x260   :  { %730 = vmatprep.subr.bf16.mxu1 %v842_v0 }
 0x263   :  { %731 = vmatpush3.bf16.msra.mxu1 %v778_v24 }
 0x264   :  { %732 = vmatprep.subr.bf16.mxu1 %v842_v0 }
 0x267   :  { %733 = vmatpush3.bf16.msra.mxu1 %v779_v25 }
 0x268   :  { %734 = vmatprep.subr.bf16.mxu1 %v842_v0 }
 0x26b   :  { %735 = vmatpush3.bf16.msra.mxu1 %v780_v26 }
 0x26c   :  { %736 = vmatprep.subr.bf16.mxu1 %v842_v0 }
 0x26f   :  { %737 = vmatpush3.bf16.msra.mxu1 %v781_v27 }
 0x270   :  { %738 = vmatprep.subr.bf16.mxu1 %v842_v0 }
 0x273   :  { %739 = vmatpush3.bf16.msra.mxu1 %v782_v28 }
 0x274   :  { %740 = vmatprep.subr.bf16.mxu1 %v842_v0 }
 0x277   :  { %741 = vmatpush3.bf16.msra.mxu1 %v783_v29 }
 0x32d   :  { %v300_v44 = vpop.f32.mrb[0].mxu1 }
 0x32e   :  { %v301_v45 = vadd.f32 %v599_v43, %v300_v44  ;;  %v704_v46 = vpop.f32.mrb[1].mxu1  ;;  %v621_v43 = vld [vmem:[%s990_s6] ss:$0 sm:$0xff] }
 0x32f   :  { %v303_v47 = vpop.f32.mrb[2].mxu1 }
 0x330   :  { %306 = vadd.xlane.f32.xlu1 %v301_v45  ;;  %v705_v48 = vpop.f32.mrb[3].mxu1 }
 0x3bd   :  { %v307_v50 = vpop.xlane.xlu1 %306 }
 0x3be   :  { %v308_v51 = vmul.f32 0.03125, %v307_v50 }
 0x3c0   :  { %v309_v52 = vsub.f32 %v301_v45, %v308_v51  ;;  %v313_v61 = vmul.f32 96.0, %v308_v51 }
 0x3c2   :  { %v310_v53 = vmul.f32 %v309_v52, %v309_v52  ;;  %v314_v62 = vmul.f32 %v313_v61, %v308_v51 }
 0x3c4   :  { %311 = vadd.xlane.f32.xlu1 %v310_v53 }
 0x451   :  { %v312_v63 = vpop.xlane.xlu1 %311 }
 0x452   :  { %v315_v1 = vsub.f32 %v312_v63, %v314_v62 }
 0x454   :  { %v316_v2 = vmul.f32 0.03125, %v315_v1 }
 0x456   :  { %v317_v3 = vadd.f32 1e-05, %v316_v2 }
 0x458   :  { %786 = vrsqrt.f32 %v317_v3 }
 0x462   :  { %v787_v4 = vpop.eup %786 }
 0x463   :  { %v319_v6 = vmul.f32 %v787_v4, %v309_v52 }
 0x465   :  { %v324_v8 = vmul.f32 %v608_v5, %v319_v6 }
 0x467   :  { %v329_v9 = vadd.f32 %v609_v7, %v324_v8 }
 0x469   :  { %v330_v10 = vmax.f32 %v329_v9, 0.0 }
 0x46b   :  { %v351_v11 = vpack.c.bf16 %v330_v10, %v330_v10 }
 0x46d   :  { %723 = vmatmul.mubr.bf16.vlgmr.msra.gmra.mrb[4].mxu0 %v351_v11 }
 0x540   :  { %v438_v13 = vpop.f32.mrb[4].mxu0 }
 0x541   :  { %v439_v14 = vadd.f32 %v610_v12, %v438_v13  ;;  %v724_v15 = vpop.f32.mrb[5].mxu0 }
 0x542   :  { %v441_v16 = vpop.f32.mrb[6].mxu0 }
 0x543   :  { %444 = vadd.xlane.f32.xlu0 %v439_v14  ;;  %v725_v17 = vpop.f32.mrb[7].mxu0 }
 0x5d0   :  { %v445_v19 = vpop.xlane.xlu0 %444 }
 0x5d1   :  { %v446_v20 = vmul.f32 0.03125, %v445_v19 }
 0x5d3   :  { %v447_v21 = vsub.f32 %v439_v14, %v446_v20  ;;  %v451_v30 = vmul.f32 96.0, %v446_v20 }
 0x5d5   :  { %v448_v22 = vmul.f32 %v447_v21, %v447_v21  ;;  %v452_v31 = vmul.f32 %v451_v30, %v446_v20 }
 0x5d7   :  { %449 = vadd.xlane.f32.xlu1 %v448_v22 }
 0x664   :  { %v450_v32 = vpop.xlane.xlu1 %449 }
 0x665   :  { %v453_v33 = vsub.f32 %v450_v32, %v452_v31 }
 0x667   :  { %v454_v34 = vmul.f32 0.03125, %v453_v33 }
 0x669   :  { %v455_v35 = vadd.f32 1e-05, %v454_v34 }
 0x66b   :  { %788 = vrsqrt.f32 %v455_v35 }
 0x675   :  { %v789_v36 = vpop.eup %788 }
 0x676   :  { %v457_v38 = vmul.f32 %v789_v36, %v447_v21 }
 0x678   :  { %v462_v40 = vmul.f32 %v619_v37, %v457_v38 }
 0x67a   :  { %v467_v0 = vadd.f32 %v620_v39, %v462_v40 }
 0x67c   :  { %v468_v41 = vmax.f32 %v467_v0, 0.0 }
 0x67e   :  { %v469_v42 = vpack.c.bf16 %v468_v41, %v468_v41 }
 0x680   :  { %743 = vmatmul.mubr.bf16.vlgmr.msra.gmra.mrb[4].mxu1 %v469_v42 }
 0x753   :  { %v575_v44 = vpop.f32.mrb[4].mxu1 }
 0x754   :  { %v576_v45 = vadd.f32 %v621_v43, %v575_v44  ;;  %v744_v46 = vpop.f32.mrb[5].mxu1 }
 0x755   :  { %v578_v47 = vpop.f32.mrb[6].mxu1 }
 0x756   :  { %581 = vst [vmem:[%s991_s7] sm:$0xff] %v576_v45  ;;  %v745_v48 = vpop.f32.mrb[7].mxu1 }
 0x757   :  { %586 = vsyncpa [#allocation3], 1 }
 0x758   :  { %587 = vsyncpa [#allocation5], 1 }

</bundles_post_ra>
